<compile_context>
chip_gen: v7x
topology: tpu7x:2x2x1
jax: 0.10.0
libtpu: 0.0.40
codegen_flags: <defaults>
</compile_context>

<pallas_src>
import jax
import jax.numpy as jnp
from jax.experimental import pallas as pl
from jax.experimental.pallas import tpu as pltpu


def _mapper_kernel(x_ref, w_ref, o_ref):
    # x_ref: (TB, fold*K), w_ref: (fold*K, fold*N) block-diagonal, o_ref: (TB, fold*N)
    # 1/sqrt(K) is already folded into the weight; only the +1.0 remains here.
    acc = jnp.dot(x_ref[...], w_ref[...], preferred_element_type=jnp.float32)
    o_ref[...] = (acc + 1.0).astype(o_ref.dtype)


def _round_up(n, m):
    return ((n + m - 1) // m) * m


def mapper_net_forward(x, w_eff, w_fold=None, *, block_rows=1024,
                       out_dtype=None, min_pallas_batch=512):
    """MapperNet forward: (x @ W) / sqrt(input_size) + 1.0.

    x:       (B, input_size) 0/1 bit-vector (f32 or bf16).
    w_eff:   (input_size, output_size), already scaled by 1/sqrt(input_size).
    w_fold:  (8*input_size, 8*output_size) block-diagonal copies of w_eff
             (built once in make_mapper_weights) -> enables the lane-folded path.
    block_rows: folded rows per grid step (multiple of 8). 1024 is safe on
             v5e/v6e/v7x (a few MB double-buffered); raise ~4-8x on v7x.
    out_dtype: pass jnp.bfloat16 for large B to halve HBM writeback
             (accumulation stays f32 on the MXU).
    """
    B, K = x.shape
    Kw, N = w_eff.shape
    assert K == Kw, (K, Kw)
    out_dtype = x.dtype if out_dtype is None else out_dtype

    # ---- tiny-batch fast path: standalone pallas_call is pure overhead here ----
    if w_fold is None or B < max(min_pallas_batch, 8):
        out = jnp.dot(x, w_eff, preferred_element_type=jnp.float32) + 1.0
        return out.astype(out_dtype)

    # ---- choose batch->lane fold: largest of {8,4,2,1} that divides B ----------
    max_fold = w_fold.shape[0] // K
    fold = 1
    for f in (8, 4, 2):
        if f <= max_fold and B % f == 0:
            fold = f
            break
    R = B // fold                            # folded rows
    if R < 8:                                # too small to tile; let XLA do it
        out = jnp.dot(x, w_eff, preferred_element_type=jnp.float32) + 1.0
        return out.astype(out_dtype)

    Kf, Nf = fold * K, fold * N
    # leading blocks of the 8-fold block-diagonal are exactly the f-fold one
    w_use = w_fold if fold == max_fold else w_fold[:Kf, :Nf]
    xf = x.reshape(R, Kf)                    # contiguous reshape: free, no copy

    # ---- row tile: multiple of 8 sublanes; >= 2 grid steps for v7x megacore ----
    TB = min(block_rows, _round_up(R, 8))
    if R >= 16:
        TB = min(TB, _round_up(pl.cdiv(R, 2), 8))
    TB = max(TB, 8)
    grid = (pl.cdiv(R, TB),)                 # partial edge block -> masked writes

    out = pl.pallas_call(
        _mapper_kernel,
        out_shape=jax.ShapeDtypeStruct((R, Nf), out_dtype),
        grid_spec=pl.GridSpec(
            grid=grid,
            in_specs=[
                pl.BlockSpec((TB, Kf), lambda i: (i, 0)),   # x tile, pipelined
                pl.BlockSpec((Kf, Nf), lambda i: (0, 0)),   # weight resident (tiny)
            ],
            out_specs=pl.BlockSpec((TB, Nf), lambda i: (i, 0)),
        ),
        compiler_params=pltpu.CompilerParams(
            dimension_semantics=("parallel",),
        ),
    )(xf, w_use)

    return out.reshape(B, N)                 # free reshape back (row-major exact)


def make_mapper_weights(key, input_size=16, output_size=64, std=1.0, fold=8):
    """MapperNet.__init__ weight setup, plus kernel-ready variants (built ONCE):
      w_raw  : orthogonal-init weight, rows normalized by unbiased std, * std
               (matches self.bit_embeddings.weight in the PyTorch module)
      w_eff  : w_raw / sqrt(input_size)            (scale folded in)
      w_fold : block-diagonal with `fold` copies of w_eff -> (fold*K, fold*N)
               (so the forward never re-materializes a padded weight per call)
    """
    a = jax.random.normal(key, (output_size, input_size), dtype=jnp.float32)
    q, r = jnp.linalg.qr(a)                          # q: (output_size, input_size)
    q = q * jnp.sign(jnp.diagonal(r))[None, :]       # sign fix (like init.orthogonal_)
    w = q.T                                          # (input_size, output_size), orthonormal rows
    w = w / jnp.std(w, axis=1, keepdims=True, ddof=1)    # torch .std() is unbiased
    w_raw = (w * std).astype(jnp.float32)
    w_eff = w_raw / jnp.sqrt(jnp.float32(input_size))

    K, N = input_size, output_size
    w_fold = jnp.zeros((fold * K, fold * N), jnp.float32)
    for i in range(fold):
        w_fold = w_fold.at[i * K:(i + 1) * K, i * N:(i + 1) * N].set(w_eff)
    return w_raw, w_eff, w_fold


if __name__ == "__main__":
    input_size, output_size = 16, 64
    key = jax.random.PRNGKey(0)
    k_w, k_x1, k_x2, k_x3 = jax.random.split(key, 4)

    w_raw, w_eff, w_fold = make_mapper_weights(k_w, input_size, output_size, std=1.0)

    def reference(x):
        # original module formula
        return (x @ w_raw) / jnp.sqrt(jnp.float32(input_size)) + 1.0

    # ---- test 1: module's stated shape (batch=2) -> tiny-batch fast path -------
    x1 = jax.random.bernoulli(k_x1, 0.5, (2, input_size)).astype(jnp.float32)
    out1 = jax.block_until_ready(mapper_net_forward(x1, w_eff, w_fold))
    assert out1.shape == (2, output_size)
    assert jnp.allclose(out1, reference(x1), atol=1e-5, rtol=1e-5), "fast path mismatch"

    # ---- test 2: Pallas path, fold=8, >=2 grid steps, f32 writeback ------------
    x2 = jax.random.bernoulli(k_x2, 0.5, (512, input_size)).astype(jnp.float32)
    out2 = jax.block_until_ready(
        mapper_net_forward(x2, w_eff, w_fold, block_rows=32, min_pallas_batch=64))
    assert out2.shape == (512, output_size)
    # tolerance covers the TPU MXU f32 matmul path (values are O(1))
    assert jnp.allclose(out2, reference(x2), atol=2e-2, rtol=2e-2), "pallas f32 mismatch"

    # ---- test 3: Pallas path, fold=4 (B % 8 != 0), partial edge block, bf16 ----
    x3 = jax.random.bernoulli(k_x3, 0.5, (300, input_size)).astype(jnp.float32)
    out3 = jax.block_until_ready(
        mapper_net_forward(x3, w_eff, w_fold, min_pallas_batch=64,
                           out_dtype=jnp.bfloat16))
    assert out3.shape == (300, output_size)
    assert jnp.allclose(out3.astype(jnp.float32), reference(x3),
                        atol=5e-2, rtol=5e-2), "pallas bf16 mismatch"

    print("KERNEL_OK")
</pallas_src>

<mosaic_0001>
module attributes {stable_mosaic.version = 11 : i64} {
  func.func @_mapper_kernel(%arg0: i32, %arg1: memref<32x128xf32, #tpu.memory_space<vmem>>, %arg2: memref<128x512xf32, #tpu.memory_space<vmem>>, %arg3: memref<32x512xf32, #tpu.memory_space<vmem>>) attributes {dimension_semantics = [#tpu.dimension_semantics<parallel>], iteration_bounds = array<i64: 2>, scalar_prefetch = 0 : i64, scratch_operands = 0 : i64, tpu.core_type = #tpu.core_type<tc>, window_params = [{transform_indices = @transform_0, window_bounds = array<i64: 32, 128>}, {pipeline_mode = #tpu.pipeline_mode<synchronous>, transform_indices = @transform_1, window_bounds = array<i64: 128, 512>}, {transform_indices = @transform_2, window_bounds = array<i64: 32, 512>}]} {
    %c0 = arith.constant 0 : index
    %c0_0 = arith.constant 0 : index
    %0 = vector.load %arg1[%c0, %c0_0] : memref<32x128xf32, #tpu.memory_space<vmem>>, vector<32x128xf32>
    %c0_1 = arith.constant 0 : index
    %c0_2 = arith.constant 0 : index
    %1 = vector.load %arg2[%c0_1, %c0_2] : memref<128x512xf32, #tpu.memory_space<vmem>>, vector<128x512xf32>
    %cst = arith.constant dense<0.000000e+00> : vector<32x512xf32>
    %2 = tpu.matmul %0, %1, %cst {dimension_numbers = #tpu.dot_dimension_numbers<[1], [0], [0], [1], [0, 0, 1, 1], [], []>} : vector<32x128xf32>, vector<128x512xf32>, vector<32x512xf32> -> vector<32x512xf32>
    %cst_3 = arith.constant 1.000000e+00 : f32
    %3 = vector.broadcast %cst_3 : f32 to vector<32x512xf32>
    %4 = arith.addf %2, %3 : vector<32x512xf32>
    %c0_4 = arith.constant 0 : index
    %c0_5 = arith.constant 0 : index
    %5 = vector.load %arg3[%c0_4, %c0_5] : memref<32x512xf32, #tpu.memory_space<vmem>>, vector<32x512xf32>
    tpu.vector_store %arg3[%c0_4, %c0_5], %4 {strides = array<i32>} : memref<32x512xf32, #tpu.memory_space<vmem>>, vector<32x512xf32>,
    return
  }
  func.func @transform_0(%arg0: i32) -> (i32, i32) {
    %c0_i32 = arith.constant 0 : i32
    %c0_i32_0 = arith.constant 0 : i32
    return %arg0, %c0_i32 : i32, i32
  }
  func.func @transform_1(%arg0: i32) -> (i32, i32) {
    %c0_i32 = arith.constant 0 : i32
    %c0_i32_0 = arith.constant 0 : i32
    %c0_i32_1 = arith.constant 0 : i32
    return %c0_i32, %c0_i32_0 : i32, i32
  }
  func.func @transform_2(%arg0: i32) -> (i32, i32) {
    %c0_i32 = arith.constant 0 : i32
    %c0_i32_0 = arith.constant 0 : i32
    return %arg0, %c0_i32 : i32, i32
  }
}

</mosaic_0001>

<bundles_post_ra>
// kernel: tpu_custom_call.1
= control target key start
LH: loop header
LB: loop body
LE: loop exit
PB: predicated region body
PF: predicated region fallthrough
CT: control target
= control target key end

     0   :  { %7 = vsyncpa [#allocation3], 0  ;;  %s1077_s0 = inlined_call_operand.hbm [shape: f32[64,128], index: 0, kind: input, shape index: {}]   ;;  %s1078_s1 = inlined_call_operand.hbm [shape: f32[128,512], index: 1, kind: input, shape index: {}]   ;;  %s1079_s2 = inlined_call_operand.hbm [shape: f32[64,512], index: 2, kind: output, shape index: {}]  }
   0x1   :  { %9 = vsyncpa [#allocation3 + $0x1], 0 }
   0x2   :  { %10 = vsyncpa [#allocation6], 0 }
   0x3   :  { %11 = vsyncpa [#allocation4], 0 }
   0x4   :  { %13 = vsyncpa [#allocation4 + $0x1], 0  ;;  %s842_s9 = smov 0   ;;  %s844_s10 = smov 0  }
   0x5   :  { %s846_s11 = smov 0   ;;  %s848_s12 = smov 0  }
   0x6 LB: > { %s863_s13 = sadd.s32 4294967295, %s815_s12   ;;  %s539_s14 = sadd.s32 4294967294, %s815_s12   ;;  %s815_s12 = sphi %s848_s12, %s1099_s12   ;;  %s811_s11 = sphi %s846_s11, %s1098_s11   ;;  %s807_s10 = sphi %s844_s10, %s1097_s10   ;;  %s803_s9 = sphi %s842_s9, %s1096_s9  }
   0x7   : > { %p39_p0 = scmp.ne.s32.totalorder %s807_s10, %s803_s9  ;;  %p1080_p1 = scmp.eq.s32.totalorder %s863_s13, 0 }
   0x8   : > { %p90_p3 = scmp.eq.s32.totalorder %s539_s14, 1  ;;  %p540_p5 = scmp.ge.s32.totalorder %s815_s12, 1 }
   0x9   : > { %p872_p4 = por %p1080_p1, %p39_p0  ;;  %p97_p7 = scmp.lt.s32.totalorder %s815_s12, 3 }
   0xa   : > { %p877_p6 = por %p90_p3, %p39_p0  ;;  %s817_s18 = smov [#allocation5]  }
   0xb   : > { %s1083_s15 = scalar_select %p872_p4, 1, 0 }
   0xc   : > { %s1084_s16 = scalar_select %p877_p6, 1, 0 }
   0xd   : > { %p882_p8 = pnand %p540_p5, %p97_p7  ;;  %s109_s19 = sshll.u32 %s817_s18, 4  ;;  %s886_s19 = int_to_ptr.vmem [resolvable:$true] %s109_s19 }
   0xe   : > { %s898_s21 = sadd.s32 1, %s815_s12   ;;  %s26_s22 = sadd.s32 1, %s811_s11 }
   0xf   : > { %s1085_s17 = scalar_select %p882_p8, 1, 0 }
  0x10   : > { %p631_p9 = pneg %p882_p8  ;;  %s23_s23 = ssub.s32 %s815_s12, %s898_s21 }
  0x11   : > { %s687_s26 = scalar_lea.hbm %s1078_s1, 8192 }
  0x12   : > { %p893_p11 = pnand %p631_p9, %p1080_p1  ;;  %p688_p12 = scmp.ne.s32.totalorder %s1078_s1, %s687_s26 }
  0x13   : > { %p694_p5 = scmp.lt.u32.totalorder %s687_s26, %s1078_s1 }
  0x14   : > { %p689_p13 = pneg %p893_p11 }
  0x16   : > { %p690_p0 = pnand %p689_p13, %p688_p12 }
  0x18   : > { %p691_p3 = pneg %p690_p0 }
  0x1a   : > { %p696_p7 = pnand %p694_p5, %p691_p3 }
  0x1c   : > { %699 = shalt.err (!%p696_p7)
}
  0x1d   : > { %s700_s3 = scalar_lea.vmem %s886_s19, 8192  ;;  %p708_p2 = scmp.lt.s32.totalorder %s886_s19, %s886_s19 }
  0x1e   : > { %p701_p9 = scmp.ne.s32.totalorder %s886_s19, %s700_s3  ;;  %p709_p6 = scmp.lt.s32.totalorder %s700_s3, %s700_s3 }
  0x20   : > { %p703_p10 = pnand %p701_p9, %p689_p13  ;;  %p710_p4 = por %p709_p6, %p708_p2 }
  0x22   : > { %p704_p1 = pneg %p703_p10 }
  0x24   : > { %p711_p8 = pnand %p710_p4, %p704_p1 }
  0x26   : > { %714 = shalt.err (!%p711_p8)
}
  0x27   : > { %s818_s4 = smov 512   ;;  %s819_s5 = smov 32  }
  0x28   : > { %634 = dma.hbm_to_vmem [thread:$0]  (!%p893_p11), %s1078_s1, 8192, %s886_s19, [#allocation6], %s818_s4, %s818_s4, %s819_s5  }
  0x29   : > { %p24_p2 = scmp.eq.s32.totalorder %s23_s23, 0  ;;  %p33_p1 = scmp.ne.s32.totalorder %s811_s11, %s807_s10 }
  0x2a   : > { %p34_p4 = scmp.eq.s32.totalorder %s815_s12, 0  ;;  %p644_p6 = scmp.lt.s32.totalorder %s815_s12, 2 }
  0x2b   : > { %s929_s8 = scalar_select %p24_p2, %s811_s11, %s26_s22  }
  0x2c   : > { %p35_p8 = por %p34_p4, %p33_p1  ;;  %p1087_p10 = scmp.eq.s32.totalorder %s863_s13, 1 }
  0x2d   : > { %s123_s18 = sand.u32 1, %s811_s11   ;;  %s556_s24 = sshll.u32 %s815_s12, 9 }
  0x2e   : > { %p933_p12 = por %p1087_p10, %p33_p1  ;;  %s543_s25 = sshll.u32 %s123_s18, 5 }
  0x2f   : > { %s942_s27 = scalar_lea.hbm %s1077_s0, %s556_s24  ;;  %s127_s19 = scalar_lea.vmem [#allocation2], %s543_s25 }
  0x30   : > { %s134_s22 = sshll.u32 %s127_s19, 4  ;;  %p944_p11 = pnand %p644_p6, %p35_p8  ;;  %s948_s22 = int_to_ptr.vmem [resolvable:$true] %s134_s22 }
  0x31   : > { %s950_s28 = scalar_lea.sflag [#allocation3], %s123_s18  ;;  %s715_s29 = scalar_lea.hbm %s942_s27, 512 }
  0x32   : > { %p716_p13 = scmp.ne.s32.totalorder %s942_s27, %s715_s29  ;;  %p717_p0 = pneg %p944_p11 }
  0x33   : > { %s720_s4 = scalar_lea.hbm %s1077_s0, 1024  ;;  %p721_p7 = scmp.lt.u32.totalorder %s942_s27, %s1077_s0 }
  0x34   : > { %p718_p3 = pnand %p717_p0, %p716_p13  ;;  %p722_p9 = scmp.lt.u32.totalorder %s720_s4, %s715_s29 }
  0x35   : > { %p724_p1 = scmp.lt.u32.totalorder %s715_s29, %s942_s27 }
  0x36   : > { %p719_p5 = pneg %p718_p3  ;;  %p723_p2 = por %p722_p9, %p721_p7 }
  0x38   : > { %p725_p4 = por %p724_p1, %p723_p2 }
  0x3a   : > { %p726_p6 = pnand %p725_p4, %p719_p5 }
  0x3c   : > { %729 = shalt.err (!%p726_p6)
}
  0x3d   : > { %s730_s7 = scalar_lea.vmem %s948_s22, 512  ;;  %s820_s18 = smov [#allocation2]  }
  0x3e   : > { %p731_p8 = scmp.ne.s32.totalorder %s948_s22, %s730_s7  ;;  %s735_s24 = sshll.u32 %s820_s18, 4  ;;  %s736_s24 = int_to_ptr.vmem [resolvable:$false] %s735_s24 }
  0x3f   : > { %s737_s25 = scalar_lea.vmem %s736_s24, 1024  ;;  %p738_p3 = scmp.lt.s32.totalorder %s948_s22, %s736_s24 }
  0x40   : > { %p733_p10 = pnand %p731_p8, %p717_p0  ;;  %p739_p7 = scmp.lt.s32.totalorder %s737_s25, %s730_s7 }
  0x42   : > { %p734_p13 = pneg %p733_p10  ;;  %p740_p9 = por %p739_p7, %p738_p3 }
  0x44   : > { %p741_p2 = pnand %p740_p9, %p734_p13 }
  0x46   : > { %744 = shalt.err (!%p741_p2)
}
  0x47   : > { %s821_s20 = smov 128   ;;  %s822_s26 = smov 8  }
  0x48   : > { %638 = dma.hbm_to_vmem [thread:$0]  (!%p944_p11), %s942_s27, 512, %s948_s22, %s950_s28, %s821_s20, %s821_s20, %s822_s26  }
  0x49   : > { %p1090_p0 = scmp.ne.s32.totalorder %s1085_s17, 0 }
  0x4a   : > { %s981_s19 = sand.u32 (!%p1090_p0), 1, %s807_s10   ;;  %p1091_p5 = scmp.ne.s32.totalorder (!%p1090_p0), %s1083_s15, 0 }
  0x4b   : > { %146 = sbr.rel (%p1090_p0) target bundleno = 365 (0x16d), region = 28  ;;  %s547_s29 = sshll.u32 (!%p1090_p0), %s981_s19, 5 }
  0x4c   : > { %s149_s30 = scalar_lea.sflag (!%p1090_p0), [#allocation3], %s981_s19  ;;  %s985_s3 = scalar_lea.vmem (!%p1090_p0), [#allocation2], %s547_s29 }
  0x52   : > { %790 = dma.done.wait (%p1091_p5), %s149_s30, 512  }
  0x53   : > { %792 = vsyncadd (%p1091_p5), %s149_s30, 4294966784  ;;  %p1092_p11 = scmp.eq.s32.totalorder %s863_s13, 0 }
  0x55   : > { %794 = dma.done.wait (%p1092_p11), [#allocation6], 8192   ;;  %p1093_p1 = pmov %p1092_p11 }
  0x56   : > { %v823_v0 = vmov 0.0   ;;  %v184_v1 = vld [vmem:[#allocation5 + $0x8] sm:$0xff]  ;;  %v186_v3 = vld [vmem:[#allocation5 + $0x18] sm:$0xff]  ;;  %v183_v6 = vld [vmem:[#allocation5] sm:$0xff]  ;;  %s549_s15 = sshll.u32 %s981_s19, 7  ;;  %s558_s27 = sshll.u32 %s863_s13, 11 }
  0x57   : > { %796 = vsyncadd (%p1093_p1), [#allocation6], 4294959104  ;;  %311 = vmatprep.mubr.f32.mxu0 %v823_v0  ;;  %400 = vmatprep.mubr.f32.mxu1 %v823_v0  ;;  %v188_v2 = vld [vmem:[#allocation5 + $0x28] sm:$0xff]  ;;  %v190_v5 = vld [vmem:[#allocation5 + $0x38] sm:$0xff]  ;;  %s1008_s17 = scalar_lea.vmem [#allocation7], %s549_s15  ;;  %s1027_s13 = scalar_lea.hbm %s1079_s2, %s558_s27 }
  0x58   : > { %v559_v4 = vpack.c.bf16 %v188_v2, %v184_v1  ;;  %v187_v7 = vld [vmem:[#allocation5 + $0x20] sm:$0xff]  ;;  %v591_v8 = vpack.c.bf16 %v190_v5, %v186_v3  ;;  %v185_v10 = vld [vmem:[#allocation5 + $0x10] sm:$0xff]  ;;  %v192_v12 = vld [vmem:[#allocation5 + $0x48] sm:$0xff]  ;;  %s456_s22 = sshll.u32 %s1008_s17, 4  ;;  %s442_s4 = scalar_lea.sflag [#allocation4], %s981_s19  ;;  %s1029_s22 = int_to_ptr.vmem [resolvable:$true] %s456_s22 }
  0x59   : > { %v561_v9 = vpack.c.bf16 %v187_v7, %v183_v6  ;;  %v189_v11 = vld [vmem:[#allocation5 + $0x30] sm:$0xff]  ;;  %v196_v14 = vld [vmem:[#allocation5 + $0x68] sm:$0xff]  ;;  %v194_v15 = vld [vmem:[#allocation5 + $0x58] sm:$0xff]  ;;  %s745_s5 = scalar_lea.vmem %s1029_s22, 2048  ;;  %s824_s6 = smov [#allocation7]  }
  0x5a   : > { %560 = vmatprep.subr.bf16.mxu0 %v559_v4  ;;  %v593_v13 = vpack.c.bf16 %v189_v11, %v185_v10  ;;  %v198_v16 = vld [vmem:[#allocation5 + $0x78] sm:$0xff]  ;;  %592 = vmatprep.subr.bf16.mxu1 %v591_v8  ;;  %v563_v17 = vpack.c.bf16 %v196_v14, %v192_v12  ;;  %v191_v19 = vld [vmem:[#allocation5 + $0x40] sm:$0xff]  ;;  %v193_v21 = vld [vmem:[#allocation5 + $0x50] sm:$0xff]  ;;  %p746_p4 = scmp.ne.s32.totalorder %s1029_s22, %s745_s5  ;;  %s749_s7 = sshll.u32 %s824_s6, 4  ;;  %s750_s7 = int_to_ptr.vmem [resolvable:$false] %s749_s7 }
  0x5b   : > { %562 = vmatpush1.bf16.msra.mxu0 %v561_v9  ;;  %v595_v18 = vpack.c.bf16 %v198_v16, %v194_v15  ;;  %v195_v20 = vld [vmem:[#allocation5 + $0x60] sm:$0xff]  ;;  %v197_v23 = vld [vmem:[#allocation5 + $0x70] sm:$0xff]  ;;  %v200_v24 = vld [vmem:[#allocation5 + $0x88] sm:$0xff]  ;;  %s751_s18 = scalar_lea.vmem %s750_s7, 4096  ;;  %p752_p10 = scmp.lt.s32.totalorder %s1029_s22, %s750_s7 }
  0x5c   : > { %594 = vmatpush1.bf16.msra.mxu1 %v593_v13  ;;  %v565_v22 = vpack.c.bf16 %v195_v20, %v191_v19  ;;  %v204_v25 = vld [vmem:[#allocation5 + $0xa8] sm:$0xff]  ;;  %564 = vmatprep.subr.bf16.mxu0 %v563_v17  ;;  %v597_v26 = vpack.c.bf16 %v197_v23, %v193_v21  ;;  %v202_v28 = vld [vmem:[#allocation5 + $0x98] sm:$0xff]  ;;  %v199_v30 = vld [vmem:[#allocation5 + $0x80] sm:$0xff]  ;;  %p747_p6 = pnand %p746_p4, %p933_p12  ;;  %p753_p13 = scmp.lt.s32.totalorder %s751_s18, %s745_s5 }
  0x5d   : > { %596 = vmatprep.subr.bf16.mxu1 %v595_v18  ;;  %v567_v27 = vpack.c.bf16 %v204_v25, %v200_v24  ;;  %v206_v29 = vld [vmem:[#allocation5 + $0xb8] sm:$0xff]  ;;  %v203_v32 = vld [vmem:[#allocation5 + $0xa0] sm:$0xff]  ;;  %v201_v33 = vld [vmem:[#allocation5 + $0x90] sm:$0xff] }
  0x5e   : > { %v599_v31 = vpack.c.bf16 %v206_v29, %v202_v28  ;;  %v205_v34 = vld [vmem:[#allocation5 + $0xb0] sm:$0xff]  ;;  %v569_v35 = vpack.c.bf16 %v203_v32, %v199_v30  ;;  %v208_v36 = vld [vmem:[#allocation5 + $0xc8] sm:$0xff]  ;;  %v210_v38 = vld [vmem:[#allocation5 + $0xd8] sm:$0xff]  ;;  %p748_p8 = pneg %p747_p6  ;;  %p754_p3 = por %p753_p13, %p752_p10 }
  0x5f   : > { %566 = vmatpush1.bf16.msra.mxu0 %v565_v22  ;;  %v212_v37 = vld [vmem:[#allocation5 + $0xe8] sm:$0xff]  ;;  %v601_v39 = vpack.c.bf16 %v205_v34, %v201_v33  ;;  %v214_v41 = vld [vmem:[#allocation5 + $0xf8] sm:$0xff]  ;;  %v207_v42 = vld [vmem:[#allocation5 + $0xc0] sm:$0xff] }
  0x60   : > { %598 = vmatpush1.bf16.msra.mxu1 %v597_v26  ;;  %568 = vmatprep.subr.bf16.mxu0 %v567_v27  ;;  %v571_v40 = vpack.c.bf16 %v212_v37, %v208_v36  ;;  %v211_v43 = vld [vmem:[#allocation5 + $0xe0] sm:$0xff]  ;;  %v603_v44 = vpack.c.bf16 %v214_v41, %v210_v38  ;;  %v209_v45 = vld [vmem:[#allocation5 + $0xd0] sm:$0xff]  ;;  %v216_v47 = vld [vmem:[#allocation5 + $0x108] sm:$0xff]  ;;  %p755_p7 = pnand %p754_p3, %p748_p8 }
  0x61   : > { %600 = vmatprep.subr.bf16.mxu1 %v599_v31  ;;  %v213_v46 = vld [vmem:[#allocation5 + $0xf0] sm:$0xff]  ;;  %v220_v48 = vld [vmem:[#allocation5 + $0x128] sm:$0xff]  ;;  %v218_v49 = vld [vmem:[#allocation5 + $0x118] sm:$0xff]  ;;  %v573_v51 = vpack.c.bf16 %v211_v43, %v207_v42 }
  0x62   : > { %v222_v50 = vld [vmem:[#allocation5 + $0x138] sm:$0xff]  ;;  %v605_v52 = vpack.c.bf16 %v213_v46, %v209_v45  ;;  %v575_v53 = vpack.c.bf16 %v220_v48, %v216_v47  ;;  %v215_v54 = vld [vmem:[#allocation5 + $0x100] sm:$0xff]  ;;  %v217_v56 = vld [vmem:[#allocation5 + $0x110] sm:$0xff] }
  0x63   : > { %570 = vmatpush1.bf16.msra.mxu0 %v569_v35  ;;  %v219_v55 = vld [vmem:[#allocation5 + $0x120] sm:$0xff]  ;;  %v607_v57 = vpack.c.bf16 %v222_v50, %v218_v49  ;;  %v221_v58 = vld [vmem:[#allocation5 + $0x130] sm:$0xff]  ;;  %v224_v59 = vld [vmem:[#allocation5 + $0x148] sm:$0xff] }
  0x64   : > { %602 = vmatpush1.bf16.msra.mxu1 %v601_v39  ;;  %572 = vmatprep.subr.bf16.mxu0 %v571_v40  ;;  %v228_v60 = vld [vmem:[#allocation5 + $0x168] sm:$0xff]  ;;  %v226_v61 = vld [vmem:[#allocation5 + $0x158] sm:$0xff]  ;;  %v577_v63 = vpack.c.bf16 %v219_v55, %v215_v54  ;;  %v609_v1 = vpack.c.bf16 %v221_v58, %v217_v56  ;;  %v223_v3 = vld [vmem:[#allocation5 + $0x140] sm:$0xff] }
  0x65   : > { %604 = vmatprep.subr.bf16.mxu1 %v603_v44  ;;  %v230_v62 = vld [vmem:[#allocation5 + $0x178] sm:$0xff]  ;;  %v579_v2 = vpack.c.bf16 %v228_v60, %v224_v59  ;;  %v227_v4 = vld [vmem:[#allocation5 + $0x160] sm:$0xff]  ;;  %v225_v5 = vld [vmem:[#allocation5 + $0x150] sm:$0xff] }
  0x66   : > { %v611_v6 = vpack.c.bf16 %v230_v62, %v226_v61  ;;  %v229_v7 = vld [vmem:[#allocation5 + $0x170] sm:$0xff]  ;;  %v232_v8 = vld [vmem:[#allocation5 + $0x188] sm:$0xff]  ;;  %v234_v10 = vld [vmem:[#allocation5 + $0x198] sm:$0xff]  ;;  %v581_v12 = vpack.c.bf16 %v227_v4, %v223_v3 }
  0x67   : > { %574 = vmatpush1.bf16.msra.mxu0 %v573_v51  ;;  %v236_v9 = vld [vmem:[#allocation5 + $0x1a8] sm:$0xff]  ;;  %v238_v11 = vld [vmem:[#allocation5 + $0x1b8] sm:$0xff]  ;;  %v613_v13 = vpack.c.bf16 %v229_v7, %v225_v5  ;;  %v231_v15 = vld [vmem:[#allocation5 + $0x180] sm:$0xff] }
  0x68   : > { %606 = vmatpush1.bf16.msra.mxu1 %v605_v52  ;;  %576 = vmatprep.subr.bf16.mxu0 %v575_v53  ;;  %v583_v14 = vpack.c.bf16 %v236_v9, %v232_v8  ;;  %v235_v16 = vld [vmem:[#allocation5 + $0x1a0] sm:$0xff]  ;;  %v233_v17 = vld [vmem:[#allocation5 + $0x190] sm:$0xff]  ;;  %v615_v18 = vpack.c.bf16 %v238_v11, %v234_v10  ;;  %v240_v20 = vld [vmem:[#allocation5 + $0x1c8] sm:$0xff] }
  0x69   : > { %608 = vmatprep.subr.bf16.mxu1 %v607_v57  ;;  %v237_v19 = vld [vmem:[#allocation5 + $0x1b0] sm:$0xff]  ;;  %v244_v21 = vld [vmem:[#allocation5 + $0x1e8] sm:$0xff]  ;;  %v242_v22 = vld [vmem:[#allocation5 + $0x1d8] sm:$0xff]  ;;  %v585_v24 = vpack.c.bf16 %v235_v16, %v231_v15 }
  0x6a   : > { %v246_v23 = vld [vmem:[#allocation5 + $0x1f8] sm:$0xff]  ;;  %v617_v25 = vpack.c.bf16 %v237_v19, %v233_v17  ;;  %v587_v26 = vpack.c.bf16 %v244_v21, %v240_v20  ;;  %v239_v27 = vld [vmem:[#allocation5 + $0x1c0] sm:$0xff]  ;;  %v241_v30 = vld [vmem:[#allocation5 + $0x1d0] sm:$0xff] }
  0x6b   : > { %578 = vmatpush1.bf16.msra.mxu0 %v577_v63  ;;  %v243_v28 = vld [vmem:[#allocation5 + $0x1e0] sm:$0xff]  ;;  %v619_v29 = vpack.c.bf16 %v246_v23, %v242_v22  ;;  %v245_v31 = vld [vmem:[#allocation5 + $0x1f0] sm:$0xff]  ;;  %v180_v35 = vld [vmem:[%s985_s3 + $0x8] sm:$0xff] }
  0x6c   : > { %610 = vmatpush1.bf16.msra.mxu1 %v609_v1  ;;  %580 = vmatprep.subr.bf16.mxu0 %v579_v2  ;;  %v589_v32 = vpack.c.bf16 %v243_v28, %v239_v27  ;;  %v621_v33 = vpack.c.bf16 %v245_v31, %v241_v30  ;;  %v179_v34 = vld [vmem:[%s985_s3] sm:$0xff]  ;;  %v181_v36 = vld [vmem:[%s985_s3 + $0x10] sm:$0xff]  ;;  %v182_v37 = vld [vmem:[%s985_s3 + $0x18] sm:$0xff] }
  0x6d   : > { %612 = vmatprep.subr.bf16.mxu1 %v611_v6 }
  0x6f   : > { %582 = vmatpush1.bf16.msra.mxu0 %v581_v12 }
  0x70   : > { %614 = vmatpush1.bf16.msra.mxu1 %v613_v13  ;;  %584 = vmatprep.subr.bf16.mxu0 %v583_v14 }
  0x71   : > { %616 = vmatprep.subr.bf16.mxu1 %v615_v18 }
  0x73   : > { %586 = vmatpush1.bf16.msra.mxu0 %v585_v24 }
  0x74   : > { %618 = vmatpush1.bf16.msra.mxu1 %v617_v25  ;;  %588 = vmatprep.subr.bf16.mxu0 %v587_v26 }
  0x75   : > { %620 = vmatprep.subr.bf16.mxu1 %v619_v29 }
  0x77   : > { %590 = vmatpush1.bf16.msra.mxu0 %v589_v32 }
  0x78   : > { %622 = vmatpush1.bf16.msra.mxu1 %v621_v33 }
  0x7a   : > { %312 = vmatmul.mubr.f32.vlgmr.msra.gmra.mrb[0].mxu0 %v179_v34 }
  0x7b   : > { %401 = vmatmul.mubr.f32.vlgmr.msra.gmra.mrb[0].mxu1 %v179_v34  ;;  %317 = vmatprep.mubr.f32.mxu0 %v823_v0 }
  0x7c   : > { %406 = vmatprep.mubr.f32.mxu1 %v823_v0 }
  0x7e   : > { %318 = vmatmul.mubr.f32.gmra.mrb[2].mxu0 %v180_v35 }
  0x7f   : > { %407 = vmatmul.mubr.f32.gmra.mrb[2].mxu1 %v180_v35  ;;  %323 = vmatprep.mubr.f32.mxu0 %v823_v0 }
  0x80   : > { %412 = vmatprep.mubr.f32.mxu1 %v823_v0 }
  0x82   : > { %324 = vmatmul.mubr.f32.gmra.mrb[4].mxu0 %v181_v36 }
  0x83   : > { %413 = vmatmul.mubr.f32.gmra.mrb[4].mxu1 %v181_v36  ;;  %329 = vmatprep.mubr.f32.mxu0 %v823_v0 }
  0x84   : > { %418 = vmatprep.mubr.f32.mxu1 %v823_v0 }
  0x86   : > { %330 = vmatmul.mubr.f32.gmra.mrb[6].mxu0 %v182_v37 }
  0x87   : > { %419 = vmatmul.mubr.f32.gmra.mrb[6].mxu1 %v182_v37 }
 0x14d   : > { %v313_v38 = vpop.f32.mrb[0].mxu0 }
 0x14e   : > { %v314_v39 = vadd.f32 1.0, %v313_v38  ;;  %v402_v40 = vpop.f32.mrb[0].mxu1  ;;  %v315_v41 = vpop.f32.mrb[1].mxu0 }
 0x14f   : > { %v403_v42 = vadd.f32 1.0, %v402_v40  ;;  %v316_v43 = vadd.f32 1.0, %v315_v41  ;;  %v404_v44 = vpop.f32.mrb[1].mxu1 }
 0x150   : > { %425 = vst [vmem:[%s1008_s17] sm:$0xff] %v314_v39  ;;  %v405_v0 = vadd.f32 1.0, %v404_v44 }
 0x151   : > { %427 = vst [vmem:[%s1008_s17 + $0x10] sm:$0xff] %v403_v42  ;;  %426 = vst [vmem:[%s1008_s17 + $0x8] sm:$0xff] %v316_v43  ;;  %v319_v45 = vpop.f32.mrb[2].mxu0 }
 0x152   : > { %428 = vst [vmem:[%s1008_s17 + $0x18] sm:$0xff] %v405_v0  ;;  %v320_v46 = vadd.f32 1.0, %v319_v45  ;;  %v408_v47 = vpop.f32.mrb[2].mxu1  ;;  %v321_v48 = vpop.f32.mrb[3].mxu0 }
 0x153   : > { %v409_v49 = vadd.f32 1.0, %v408_v47  ;;  %v322_v50 = vadd.f32 1.0, %v321_v48  ;;  %v410_v51 = vpop.f32.mrb[3].mxu1 }
 0x154   : > { %429 = vst [vmem:[%s1008_s17 + $0x20] sm:$0xff] %v320_v46  ;;  %v411_v52 = vadd.f32 1.0, %v410_v51 }
 0x155   : > { %431 = vst [vmem:[%s1008_s17 + $0x30] sm:$0xff] %v409_v49  ;;  %430 = vst [vmem:[%s1008_s17 + $0x28] sm:$0xff] %v322_v50  ;;  %v325_v53 = vpop.f32.mrb[4].mxu0 }
 0x156   : > { %432 = vst [vmem:[%s1008_s17 + $0x38] sm:$0xff] %v411_v52  ;;  %v326_v54 = vadd.f32 1.0, %v325_v53  ;;  %v414_v55 = vpop.f32.mrb[4].mxu1  ;;  %v327_v56 = vpop.f32.mrb[5].mxu0 }
 0x157   : > { %v415_v57 = vadd.f32 1.0, %v414_v55  ;;  %v328_v58 = vadd.f32 1.0, %v327_v56  ;;  %v416_v59 = vpop.f32.mrb[5].mxu1 }
 0x158   : > { %433 = vst [vmem:[%s1008_s17 + $0x40] sm:$0xff] %v326_v54  ;;  %v417_v60 = vadd.f32 1.0, %v416_v59 }
 0x159   : > { %435 = vst [vmem:[%s1008_s17 + $0x50] sm:$0xff] %v415_v57  ;;  %434 = vst [vmem:[%s1008_s17 + $0x48] sm:$0xff] %v328_v58  ;;  %v331_v61 = vpop.f32.mrb[6].mxu0 }
 0x15a   : > { %436 = vst [vmem:[%s1008_s17 + $0x58] sm:$0xff] %v417_v60  ;;  %v332_v62 = vadd.f32 1.0, %v331_v61  ;;  %v420_v63 = vpop.f32.mrb[6].mxu1  ;;  %v333_v1 = vpop.f32.mrb[7].mxu0 }
 0x15b   : > { %v421_v2 = vadd.f32 1.0, %v420_v63  ;;  %v334_v3 = vadd.f32 1.0, %v333_v1  ;;  %v422_v4 = vpop.f32.mrb[7].mxu1 }
 0x15c   : > { %437 = vst [vmem:[%s1008_s17 + $0x60] sm:$0xff] %v332_v62  ;;  %v423_v5 = vadd.f32 1.0, %v422_v4 }
 0x15d   : > { %439 = vst [vmem:[%s1008_s17 + $0x70] sm:$0xff] %v421_v2  ;;  %438 = vst [vmem:[%s1008_s17 + $0x68] sm:$0xff] %v334_v3 }
 0x15e   : > { %440 = vst [vmem:[%s1008_s17 + $0x78] sm:$0xff] %v423_v5 }
 0x15f   : > { %758 = shalt.err (!%p755_p7)
}
 0x160   : > { %s759_s24 = scalar_lea.hbm %s1027_s13, 2048  ;;  %s763_s26 = scalar_lea.hbm %s1079_s2, 4096 }
 0x161   : > { %p760_p9 = scmp.ne.s32.totalorder %s1027_s13, %s759_s24  ;;  %p764_p5 = scmp.lt.u32.totalorder %s1027_s13, %s1079_s2 }
 0x162   : > { %p765_p11 = scmp.lt.u32.totalorder %s763_s26, %s759_s24  ;;  %p767_p4 = scmp.lt.u32.totalorder %s759_s24, %s1027_s13 }
 0x163   : > { %p761_p2 = pnand %p760_p9, %p933_p12 }
 0x164   : > { %p766_p1 = por %p765_p11, %p764_p5 }
 0x165   : > { %p762_p0 = pneg %p761_p2 }
 0x166   : > { %p768_p6 = por %p767_p4, %p766_p1 }
 0x168   : > { %p769_p8 = pnand %p768_p6, %p762_p0 }
 0x16a   : > { %772 = shalt.err (!%p769_p8)
}
 0x16b   : > { %s825_s3 = smov 512   ;;  %s826_s15 = smov 32  }
 0x16c   : > { %629 = dma.vmem_to_hbm [thread:$0]  (%p933_p12), %s1029_s22, 2048, %s1027_s13, %s442_s4, %s825_s3, %s825_s3, %s826_s15  }
 0x16d PF: > { %s471_s17 = sand.u32 1, %s803_s9   ;;  %p1094_p10 = scmp.ne.s32.totalorder %s1084_s16, 0 }
 0x16e   : > { %p1095_p13 = scmp.ge.s32.totalorder %s815_s12, 2  ;;  %s472_s27 = scalar_lea.sflag [#allocation4], %s471_s17 }
 0x170   : > { %p640_p3 = pnand %p1095_p13, %p1094_p10 }
 0x172   : > { %798 = dma.done.wait (!%p640_p3), %s472_s27, 2048  }
 0x173   : > { %800 = vsyncadd (!%p640_p3), %s472_s27, 4294965248  ;;  %p16_p7 = scmp.ge.s32.totalorder %s898_s21, 4   ;;  %s1096_s9 = smov %s807_s10 }
 0x174   : > { %s1097_s10 = smov %s811_s11  ;;  %s1098_s11 = smov %s929_s8 }
 0x175   : > { %s1099_s12 = smov %s898_s21  ;;  %18 = sbr.rel (!%p16_p7) target bundleno = 6 (0x6), region = 77 }
 0x17c   :  { %477 = vsyncpa [#allocation3], 1 }
 0x17d   :  { %479 = vsyncpa [#allocation3 + $0x1], 1 }
 0x17e   :  { %480 = vsyncpa [#allocation6], 1 }
 0x17f   :  { %481 = vsyncpa [#allocation4], 1 }
 0x180   :  { %483 = vsyncpa [#allocation4 + $0x1], 1 }

</bundles_post_ra>
